<compile_context>
chip_gen: v7x
topology: tpu7x:2x2x1
jax: 0.10.0
libtpu: 0.0.40
codegen_flags: <defaults>
</compile_context>

<pallas_src>
import functools

import jax
import jax.numpy as jnp
from jax.experimental import pallas as pl
from jax.experimental.pallas import tpu as pltpu


def make_scale_kernel(n_layers):
    """Kernel refs = (x, w0, b0, w1, b1, ..., wL, bL, out), natural (B, D) layout."""

    def kernel(*refs):
        x_ref = refs[0]
        o_ref = refs[-1]
        h = x_ref[...].astype(jnp.float32)                   # (TM, D)
        for l in range(n_layers):
            w_ref = refs[1 + 2 * l]                          # (in, out)  f32
            b_ref = refs[2 + 2 * l]                          # (1, out)   f32
            h = jnp.dot(h, w_ref[...],
                        preferred_element_type=jnp.float32) + b_ref[...]
            if l < n_layers - 1:
                h = jnp.maximum(h, 0.0)                      # ReLU (VPU)
        o_ref[...] = jnp.tanh(h).astype(o_ref.dtype)         # Tanh (EUP) + store

    return kernel


def _pick_batch_tile(B, tm):
    """Batch tile TM (rows per grid step).

    Small B -> one full block (single-TC chips: extra steps are pure overhead).
    Large B -> lane-aligned tile capped at B/2 so the grid has >= 2 steps and
    the batch axis can shard across both TensorCores on v7x.
    """
    if B < 512:
        return B
    cap = max(128, (B // 2) // 128 * 128)
    return min(tm, cap)


@functools.partial(jax.jit, static_argnames=("tm", "out_dtype"))
def scale_forward(x, params, *, tm=2048, out_dtype=None):
    """Forward pass of Scale.

    x: (B, D) float32.
    params: ((w0, b0), ..., (wL, bL)) with w_i (in, out), b_i (1, out) or (out,).
    tm: max batch tile (rows per grid step).
    out_dtype: output dtype; defaults to x.dtype. Pass jnp.bfloat16 to halve
      the output writeback if the consumer tolerates it (tanh output in [-1,1]).
    """
    B, D = x.shape
    n_layers = len(params)
    out_dtype = x.dtype if out_dtype is None else out_dtype

    TM = _pick_batch_tile(B, tm)
    grid = (pl.cdiv(B, TM),)

    flat_args = [x]
    in_specs = [pl.BlockSpec((TM, D), lambda i: (i, 0))]
    resident = lambda i: (0, 0)                              # weights DMA'd once
    for (w, b) in params:
        w = w.astype(jnp.float32)
        b2 = b.reshape(1, -1).astype(jnp.float32)
        flat_args += [w, b2]
        in_specs += [pl.BlockSpec(w.shape, resident),
                     pl.BlockSpec(b2.shape, resident)]

    out = pl.pallas_call(
        make_scale_kernel(n_layers),
        out_shape=jax.ShapeDtypeStruct((B, D), out_dtype),
        grid_spec=pltpu.PrefetchScalarGridSpec(
            num_scalar_prefetch=0,
            grid=grid,
            in_specs=in_specs,
            out_specs=pl.BlockSpec((TM, D), lambda i: (i, 0)),
        ),
        compiler_params=pltpu.CompilerParams(
            dimension_semantics=("parallel",),               # megacore shard on v7x
        ),
    )(*flat_args)

    return out


def init_scale_params(key, D, hidden, dtype=jnp.float32):
    """Deterministic init matching the layer shapes of Scale(D, hidden)."""
    dims = [D] + list(hidden) + [D]      # get_layers appends D (is_spline=False)
    params = []
    for i in range(len(dims) - 1):
        key, kw, kb = jax.random.split(key, 3)
        fan_in, fan_out = dims[i], dims[i + 1]
        bound = 1.0 / jnp.sqrt(fan_in)
        w = jax.random.uniform(kw, (fan_in, fan_out), dtype, -bound, bound)
        b = jax.random.uniform(kb, (1, fan_out), dtype, -bound, bound)
        params.append((w, b))
    return tuple(params)


def scale_reference(x, params):
    """Pure-JAX f32 reference of the same forward pass."""
    h = x
    n = len(params)
    for l, (w, b) in enumerate(params):
        h = h @ w + b.reshape(1, -1)
        if l < n - 1:
            h = jnp.maximum(h, 0.0)
    return jnp.tanh(h)


if __name__ == "__main__":
    key = jax.random.PRNGKey(0)
    D = 16
    hidden = [32, 32]

    k_x, k_p, k_x2 = jax.random.split(key, 3)
    params = init_scale_params(k_p, D, hidden)

    # Small batch: single full-batch block, grid of 1 (best on single-TC chips).
    B1 = 256
    x1 = jax.random.normal(k_x, (B1, D), dtype=jnp.float32)
    out1 = jax.block_until_ready(scale_forward(x1, params))
    ref1 = scale_reference(x1, params)
    assert out1.shape == (B1, D)
    assert jnp.allclose(out1, ref1, atol=1e-5, rtol=1e-5)

    # Larger batch: >= 2 grid steps so the parallel batch axis exercises the
    # pipeline (and can shard across both TensorCores on v7x).
    B2 = 1024
    x2 = jax.random.normal(k_x2, (B2, D), dtype=jnp.float32)
    out2 = jax.block_until_ready(scale_forward(x2, params))
    ref2 = scale_reference(x2, params)
    assert out2.shape == (B2, D)
    assert jnp.allclose(out2, ref2, atol=1e-5, rtol=1e-5)

    print("KERNEL_OK")
</pallas_src>

<mosaic_0001>
module attributes {stable_mosaic.version = 11 : i64} {
  func.func @kernel(%arg0: i32, %arg1: memref<256x16xf32, #tpu.memory_space<vmem>>, %arg2: memref<16x32xf32, #tpu.memory_space<vmem>>, %arg3: memref<1x32xf32, #tpu.memory_space<vmem>>, %arg4: memref<32x32xf32, #tpu.memory_space<vmem>>, %arg5: memref<1x32xf32, #tpu.memory_space<vmem>>, %arg6: memref<32x16xf32, #tpu.memory_space<vmem>>, %arg7: memref<1x16xf32, #tpu.memory_space<vmem>>, %arg8: memref<256x16xf32, #tpu.memory_space<vmem>>) attributes {dimension_semantics = [#tpu.dimension_semantics<parallel>], iteration_bounds = array<i64: 1>, scalar_prefetch = 0 : i64, scratch_operands = 0 : i64, tpu.core_type = #tpu.core_type<tc>, window_params = [{transform_indices = @transform_0, window_bounds = array<i64: 256, 16>}, {pipeline_mode = #tpu.pipeline_mode<synchronous>, transform_indices = @transform_1, window_bounds = array<i64: 16, 32>}, {pipeline_mode = #tpu.pipeline_mode<synchronous>, transform_indices = @transform_2, window_bounds = array<i64: 1, 32>}, {pipeline_mode = #tpu.pipeline_mode<synchronous>, transform_indices = @transform_3, window_bounds = array<i64: 32, 32>}, {pipeline_mode = #tpu.pipeline_mode<synchronous>, transform_indices = @transform_4, window_bounds = array<i64: 1, 32>}, {pipeline_mode = #tpu.pipeline_mode<synchronous>, transform_indices = @transform_5, window_bounds = array<i64: 32, 16>}, {pipeline_mode = #tpu.pipeline_mode<synchronous>, transform_indices = @transform_6, window_bounds = array<i64: 1, 16>}, {transform_indices = @transform_7, window_bounds = array<i64: 256, 16>}]} {
    %c0 = arith.constant 0 : index
    %c0_0 = arith.constant 0 : index
    %0 = vector.load %arg1[%c0, %c0_0] : memref<256x16xf32, #tpu.memory_space<vmem>>, vector<256x16xf32>
    %c0_1 = arith.constant 0 : index
    %c0_2 = arith.constant 0 : index
    %1 = vector.load %arg2[%c0_1, %c0_2] : memref<16x32xf32, #tpu.memory_space<vmem>>, vector<16x32xf32>
    %cst = arith.constant dense<0.000000e+00> : vector<256x32xf32>
    %2 = tpu.matmul %0, %1, %cst {dimension_numbers = #tpu.dot_dimension_numbers<[1], [0], [0], [1], [0, 0, 1, 1], [], []>} : vector<256x16xf32>, vector<16x32xf32>, vector<256x32xf32> -> vector<256x32xf32>
    %c0_3 = arith.constant 0 : index
    %c0_4 = arith.constant 0 : index
    %3 = vector.load %arg3[%c0_3, %c0_4] : memref<1x32xf32, #tpu.memory_space<vmem>>, vector<1x32xf32>
    %4 = vector.broadcast %3 : vector<1x32xf32> to vector<256x32xf32>
    %5 = arith.addf %2, %4 : vector<256x32xf32>
    %cst_5 = arith.constant 0.000000e+00 : f32
    %6 = vector.broadcast %cst_5 : f32 to vector<256x32xf32>
    %7 = arith.maximumf %5, %6 : vector<256x32xf32>
    %c0_6 = arith.constant 0 : index
    %c0_7 = arith.constant 0 : index
    %8 = vector.load %arg4[%c0_6, %c0_7] : memref<32x32xf32, #tpu.memory_space<vmem>>, vector<32x32xf32>
    %cst_8 = arith.constant dense<0.000000e+00> : vector<256x32xf32>
    %9 = tpu.matmul %7, %8, %cst_8 {dimension_numbers = #tpu.dot_dimension_numbers<[1], [0], [0], [1], [0, 0, 1, 1], [], []>} : vector<256x32xf32>, vector<32x32xf32>, vector<256x32xf32> -> vector<256x32xf32>
    %c0_9 = arith.constant 0 : index
    %c0_10 = arith.constant 0 : index
    %10 = vector.load %arg5[%c0_9, %c0_10] : memref<1x32xf32, #tpu.memory_space<vmem>>, vector<1x32xf32>
    %11 = vector.broadcast %10 : vector<1x32xf32> to vector<256x32xf32>
    %12 = arith.addf %9, %11 : vector<256x32xf32>
    %cst_11 = arith.constant 0.000000e+00 : f32
    %13 = vector.broadcast %cst_11 : f32 to vector<256x32xf32>
    %14 = arith.maximumf %12, %13 : vector<256x32xf32>
    %c0_12 = arith.constant 0 : index
    %c0_13 = arith.constant 0 : index
    %15 = vector.load %arg6[%c0_12, %c0_13] : memref<32x16xf32, #tpu.memory_space<vmem>>, vector<32x16xf32>
    %cst_14 = arith.constant dense<0.000000e+00> : vector<256x16xf32>
    %16 = tpu.matmul %14, %15, %cst_14 {dimension_numbers = #tpu.dot_dimension_numbers<[1], [0], [0], [1], [0, 0, 1, 1], [], []>} : vector<256x32xf32>, vector<32x16xf32>, vector<256x16xf32> -> vector<256x16xf32>
    %c0_15 = arith.constant 0 : index
    %c0_16 = arith.constant 0 : index
    %17 = vector.load %arg7[%c0_15, %c0_16] : memref<1x16xf32, #tpu.memory_space<vmem>>, vector<1x16xf32>
    %18 = vector.broadcast %17 : vector<1x16xf32> to vector<256x16xf32>
    %19 = arith.addf %16, %18 : vector<256x16xf32>
    %20 = math.tanh %19 : vector<256x16xf32>
    %c0_17 = arith.constant 0 : index
    %c0_18 = arith.constant 0 : index
    %21 = vector.load %arg8[%c0_17, %c0_18] : memref<256x16xf32, #tpu.memory_space<vmem>>, vector<256x16xf32>
    tpu.vector_store %arg8[%c0_17, %c0_18], %20 {strides = array<i32>} : memref<256x16xf32, #tpu.memory_space<vmem>>, vector<256x16xf32>,
    return
  }
  func.func @transform_0(%arg0: i32) -> (i32, i32) {
    %c0_i32 = arith.constant 0 : i32
    %c0_i32_0 = arith.constant 0 : i32
    return %arg0, %c0_i32 : i32, i32
  }
  func.func @transform_1(%arg0: i32) -> (i32, i32) {
    %c0_i32 = arith.constant 0 : i32
    %c0_i32_0 = arith.constant 0 : i32
    %c0_i32_1 = arith.constant 0 : i32
    return %c0_i32, %c0_i32_0 : i32, i32
  }
  func.func @transform_2(%arg0: i32) -> (i32, i32) {
    %c0_i32 = arith.constant 0 : i32
    %c0_i32_0 = arith.constant 0 : i32
    %c0_i32_1 = arith.constant 0 : i32
    return %c0_i32, %c0_i32_0 : i32, i32
  }
  func.func @transform_3(%arg0: i32) -> (i32, i32) {
    %c0_i32 = arith.constant 0 : i32
    %c0_i32_0 = arith.constant 0 : i32
    %c0_i32_1 = arith.constant 0 : i32
    return %c0_i32, %c0_i32_0 : i32, i32
  }
  func.func @transform_4(%arg0: i32) -> (i32, i32) {
    %c0_i32 = arith.constant 0 : i32
    %c0_i32_0 = arith.constant 0 : i32
    %c0_i32_1 = arith.constant 0 : i32
    return %c0_i32, %c0_i32_0 : i32, i32
  }
  func.func @transform_5(%arg0: i32) -> (i32, i32) {
    %c0_i32 = arith.constant 0 : i32
    %c0_i32_0 = arith.constant 0 : i32
    %c0_i32_1 = arith.constant 0 : i32
    return %c0_i32, %c0_i32_0 : i32, i32
  }
  func.func @transform_6(%arg0: i32) -> (i32, i32) {
    %c0_i32 = arith.constant 0 : i32
    %c0_i32_0 = arith.constant 0 : i32
    %c0_i32_1 = arith.constant 0 : i32
    return %c0_i32, %c0_i32_0 : i32, i32
  }
  func.func @transform_7(%arg0: i32) -> (i32, i32) {
    %c0_i32 = arith.constant 0 : i32
    %c0_i32_0 = arith.constant 0 : i32
    return %arg0, %c0_i32 : i32, i32
  }
}

</mosaic_0001>

<bundles_post_ra>
// kernel: scale_forward.1
= control target key start
LH: loop header
LB: loop body
LE: loop exit
PB: predicated region body
PF: predicated region fallthrough
CT: control target
= control target key end

     0   :  { %vm67_vm0 = vcmask 130048   ;;  %vm432_vm1 = vcmask 261120   ;;  %s2163_s1 = inlined_call_operand.vmem [shape: f32[16,32], index: 1, kind: input, shape index: {}]   ;;  %s2164_s0 = inlined_call_operand.vmem [shape: f32[256,16], index: 0, kind: input, shape index: {}]   ;;  %s2165_s3 = inlined_call_operand.vmem [shape: f32[32,32], index: 3, kind: input, shape index: {}]   ;;  %s2166_s5 = inlined_call_operand.vmem [shape: f32[32,16], index: 5, kind: input, shape index: {}]   ;;  %s2167_s2 = inlined_call_operand.vmem [shape: f32[1,32], index: 2, kind: input, shape index: {}]   ;;  %s2168_s4 = inlined_call_operand.vmem [shape: f32[1,32], index: 4, kind: input, shape index: {}]   ;;  %s2169_s6 = inlined_call_operand.vmem [shape: f32[1,16], index: 6, kind: input, shape index: {}]   ;;  %s2170_s7 = inlined_call_operand.vmem [shape: f32[256,16], index: 7, kind: output, shape index: {}]  }
   0x1   :  { %v58_v0 = vld [vmem:[%s2163_s1] sm:$0xff]  ;;  %v59_v1 = vld [vmem:[%s2163_s1 + $0x8] sm:$0xff]  ;;  %v28_v5 = vld [vmem:[%s2164_s0 + $0x10] sm:$0xff] }
   0x2   :  { %v26_v2 = vld [vmem:[%s2164_s0] sm:$0xff]  ;;  %v1555_v3 = vpack.c.bf16 %v59_v1, %v58_v0  ;;  %v27_v4 = vld [vmem:[%s2164_s0 + $0x8] sm:$0xff]  ;;  %v44_v8 = vld [vmem:[%s2164_s0 + $0x90] sm:$0xff] }
   0x3   :  { %1395 = vmatprep.mubr.msk.f32.mxu0 %vm67_vm0, %v26_v2  ;;  %v42_v6 = vld [vmem:[%s2164_s0 + $0x80] sm:$0xff]  ;;  %v43_v7 = vld [vmem:[%s2164_s0 + $0x88] sm:$0xff]  ;;  %v29_v9 = vld [vmem:[%s2164_s0 + $0x18] sm:$0xff] }
   0x4   :  { %1556 = vmatprep.subr.bf16.mxu0 %v1555_v3  ;;  %1575 = vmatprep.subr.bf16.mxu1 %v1555_v3  ;;  %v30_v10 = vld [vmem:[%s2164_s0 + $0x20] sm:$0xff]  ;;  %v45_v11 = vld [vmem:[%s2164_s0 + $0x98] sm:$0xff]  ;;  %v422_v14 = vld [vmem:[%s2165_s3 + $0x8] sm:$0xff] }
   0x5   :  { %1558 = vmatpush3.bf16.msra.mxu0 %v1555_v3  ;;  %1576 = vmatpush3.bf16.msra.mxu1 %v1555_v3  ;;  %v46_v12 = vld [vmem:[%s2164_s0 + $0xa0] sm:$0xff]  ;;  %v31_v15 = vld [vmem:[%s2164_s0 + $0x28] sm:$0xff]  ;;  %v423_v17 = vld [vmem:[%s2165_s3 + $0x10] sm:$0xff] }
   0x6   :  { %1419 = vmatprep.mubr.msk.f32.mxu1 %vm67_vm0, %v42_v6  ;;  %v421_v13 = vld [vmem:[%s2165_s3] sm:$0xff]  ;;  %v424_v18 = vld [vmem:[%s2165_s3 + $0x18] sm:$0xff]  ;;  %v32_v19 = vld [vmem:[%s2164_s0 + $0x30] sm:$0xff] }
   0x7   :  { %v1559_v16 = vpack.c.bf16 %v422_v14, %v421_v13  ;;  %v47_v20 = vld [vmem:[%s2164_s0 + $0xa8] sm:$0xff]  ;;  %v1563_v21 = vpack.c.bf16 %v424_v18, %v423_v17  ;;  %v48_v22 = vld [vmem:[%s2164_s0 + $0xb0] sm:$0xff]  ;;  %v33_v23 = vld [vmem:[%s2164_s0 + $0x38] sm:$0xff] }
   0x8   :  { %1396 = vmatmul.mubr.msk.f32.vlgmr.msra.gmra.mrb[0].mxu0 %vm67_vm0, %v27_v4  ;;  %1420 = vmatmul.mubr.msk.f32.vlgmr.msra.gmra.mrb[0].mxu1 %vm67_vm0, %v43_v7  ;;  %v34_v24 = vld [vmem:[%s2164_s0 + $0x40] sm:$0xff]  ;;  %v49_v25 = vld [vmem:[%s2164_s0 + $0xb8] sm:$0xff]  ;;  %v35_v27 = vld [vmem:[%s2164_s0 + $0x48] sm:$0xff] }
   0x9   :  { %1398 = vmatprep.mubr.msk.f32.mxu0 %vm67_vm0, %v28_v5  ;;  %1422 = vmatprep.mubr.msk.f32.mxu1 %vm67_vm0, %v44_v8  ;;  %v50_v26 = vld [vmem:[%s2164_s0 + $0xc0] sm:$0xff]  ;;  %v36_v28 = vld [vmem:[%s2164_s0 + $0x50] sm:$0xff]  ;;  %v51_v29 = vld [vmem:[%s2164_s0 + $0xc8] sm:$0xff] }
   0xa   :  { %1560 = vmatprep.subr.bf16.mxu1 %v1559_v16  ;;  %v52_v30 = vld [vmem:[%s2164_s0 + $0xd0] sm:$0xff]  ;;  %v37_v31 = vld [vmem:[%s2164_s0 + $0x58] sm:$0xff]  ;;  %v38_v32 = vld [vmem:[%s2164_s0 + $0x60] sm:$0xff] }
   0xb   :  { %1562 = vmatpush3.bf16.msra.mxu1 %v1559_v16  ;;  %v53_v33 = vld [vmem:[%s2164_s0 + $0xd8] sm:$0xff]  ;;  %v54_v34 = vld [vmem:[%s2164_s0 + $0xe0] sm:$0xff]  ;;  %v39_v35 = vld [vmem:[%s2164_s0 + $0x68] sm:$0xff] }
   0xc   :  { %1399 = vmatmul.mubr.msk.f32.gmra.mrb[2].mxu0 %vm67_vm0, %v29_v9  ;;  %1423 = vmatmul.mubr.msk.f32.gmra.mrb[2].mxu1 %vm67_vm0, %v45_v11  ;;  %v40_v36 = vld [vmem:[%s2164_s0 + $0x70] sm:$0xff]  ;;  %v55_v37 = vld [vmem:[%s2164_s0 + $0xe8] sm:$0xff]  ;;  %v41_v39 = vld [vmem:[%s2164_s0 + $0x78] sm:$0xff] }
   0xd   :  { %1401 = vmatprep.mubr.msk.f32.mxu0 %vm67_vm0, %v30_v10  ;;  %1425 = vmatprep.mubr.msk.f32.mxu1 %vm67_vm0, %v46_v12  ;;  %v56_v38 = vld [vmem:[%s2164_s0 + $0xf0] sm:$0xff]  ;;  %v57_v40 = vld [vmem:[%s2164_s0 + $0xf8] sm:$0xff]  ;;  %v786_v41 = vld [vmem:[%s2166_s5] sm:$0xff] }
   0xe   :  { %1564 = vmatprep.subr.bf16.mxu1 %v1563_v21  ;;  %v787_v42 = vld [vmem:[%s2166_s5 + $0x8] sm:$0xff]  ;;  %v788_v43 = vld [vmem:[%s2166_s5 + $0x10] sm:$0xff]  ;;  %v789_v45 = vld [vmem:[%s2166_s5 + $0x18] sm:$0xff] }
   0xf   :  { %1566 = vmatpush3.bf16.msra.mxu1 %v1563_v21  ;;  %v1567_v44 = vpack.c.bf16 %v787_v42, %v786_v41  ;;  %v1571_v46 = vpack.c.bf16 %v789_v45, %v788_v43  ;;  %v1842_v47 = vld [vmem:[%s2167_s2] ss:$0 sm:$0xff] }
  0x10   :  { %1402 = vmatmul.mubr.msk.f32.gmra.mrb[4].mxu0 %vm67_vm0, %v31_v15  ;;  %1426 = vmatmul.mubr.msk.f32.gmra.mrb[4].mxu1 %vm67_vm0, %v47_v20 }
  0x11   :  { %1404 = vmatprep.mubr.msk.f32.mxu0 %vm67_vm0, %v32_v19  ;;  %1428 = vmatprep.mubr.msk.f32.mxu1 %vm67_vm0, %v48_v22 }
  0x12   :  { %1568 = vmatprep.subr.bf16.mxu0 %v1567_v44 }
  0x13   :  { %1570 = vmatpush3.bf16.msra.mxu0 %v1567_v44 }
  0x14   :  { %1405 = vmatmul.mubr.msk.f32.gmra.mrb[6].mxu0 %vm67_vm0, %v33_v23  ;;  %1429 = vmatmul.mubr.msk.f32.gmra.mrb[6].mxu1 %vm67_vm0, %v49_v25 }
  0x15   :  { %1407 = vmatprep.mubr.msk.f32.mxu0 %vm67_vm0, %v34_v24  ;;  %1431 = vmatprep.mubr.msk.f32.mxu1 %vm67_vm0, %v50_v26 }
  0x16   :  { %1572 = vmatprep.subr.bf16.mxu0 %v1571_v46 }
  0x17   :  { %1574 = vmatpush3.bf16.msra.mxu0 %v1571_v46 }
  0x18   :  { %1408 = vmatmul.mubr.msk.f32.gmra.mrb[8].mxu0 %vm67_vm0, %v35_v27  ;;  %1432 = vmatmul.mubr.msk.f32.gmra.mrb[8].mxu1 %vm67_vm0, %v51_v29 }
  0x19   :  { %1410 = vmatprep.mubr.msk.f32.mxu0 %vm67_vm0, %v36_v28  ;;  %1434 = vmatprep.mubr.msk.f32.mxu1 %vm67_vm0, %v52_v30 }
  0x1c   :  { %1411 = vmatmul.mubr.msk.f32.gmra.mrb[10].mxu0 %vm67_vm0, %v37_v31  ;;  %1435 = vmatmul.mubr.msk.f32.gmra.mrb[10].mxu1 %vm67_vm0, %v53_v33 }
  0x1d   :  { %1413 = vmatprep.mubr.msk.f32.mxu0 %vm67_vm0, %v38_v32  ;;  %1437 = vmatprep.mubr.msk.f32.mxu1 %vm67_vm0, %v54_v34 }
  0x20   :  { %1414 = vmatmul.mubr.msk.f32.gmra.mrb[12].mxu0 %vm67_vm0, %v39_v35  ;;  %1438 = vmatmul.mubr.msk.f32.gmra.mrb[12].mxu1 %vm67_vm0, %v55_v37 }
  0x21   :  { %1416 = vmatprep.mubr.msk.f32.mxu0 %vm67_vm0, %v40_v36  ;;  %1440 = vmatprep.mubr.msk.f32.mxu1 %vm67_vm0, %v56_v38 }
  0x24   :  { %1417 = vmatmul.mubr.msk.f32.gmra.mrb[14].mxu0 %vm67_vm0, %v41_v39  ;;  %1441 = vmatmul.mubr.msk.f32.gmra.mrb[14].mxu1 %vm67_vm0, %v57_v40 }
  0xdb   :  { %v1397_v48 = vpop.f32.mrb[0].mxu0  ;;  %v1845_v51 = vpop.f32.mrb[0].mxu1 }
  0xdc   :  { %v236_v49 = vadd.f32 %v1397_v48, %v1842_v47  ;;  %v230_v50 = vpop.f32.mrb[1].mxu0  ;;  %v1848_v53 = vpop.f32.mrb[1].mxu1 }
  0xdd   :  { %v231_v52 = vadd.f32 %v1842_v47, %v230_v50  ;;  %v311_v40 = vadd.f32 %v1842_v47, %v1848_v53  ;;  %v316_v53 = vadd.f32 %v1845_v51, %v1842_v47 }
  0xde   :  { %v390_v56 = vmax.f32 %v236_v49, 0.0 }
  0xdf   :  { %v389_v54 = vmax.f32 %v231_v52, 0.0  ;;  %v1400_v55 = vpop.f32.mrb[2].mxu0  ;;  %v1851_v59 = vpop.f32.mrb[2].mxu1  ;;  %v405_v49 = vmax.f32 %v311_v40, 0.0 }
  0xe0   :  { %v246_v57 = vadd.f32 %v1400_v55, %v1842_v47  ;;  %v240_v58 = vpop.f32.mrb[3].mxu0  ;;  %v1855_v61 = vpop.f32.mrb[3].mxu1 }
  0xe1   :  { %v241_v60 = vadd.f32 %v1842_v47, %v240_v58  ;;  %1451 = vmatprep.mubr.msk.f32.mxu1 %vm432_vm1, %v389_v54  ;;  %v321_v50 = vadd.f32 %v1842_v47, %v1855_v61 }
  0xe2   :  { %1452 = vmatmul.mubr.msk.f32.vlgmr.msra.gmra.mrb[16].mxu1 %vm432_vm1, %v390_v56  ;;  %v392_v0 = vmax.f32 %v246_v57, 0.0  ;;  %v406_v56 = vmax.f32 %v316_v53, 0.0  ;;  %v326_v57 = vadd.f32 %v1851_v59, %v1842_v47 }
  0xe3   :  { %v391_v62 = vmax.f32 %v241_v60, 0.0  ;;  %v1403_v63 = vpop.f32.mrb[4].mxu0  ;;  %v1859_v3 = vpop.f32.mrb[4].mxu1  ;;  %v407_v54 = vmax.f32 %v321_v50, 0.0 }
  0xe4   :  { %v256_v1 = vadd.f32 %v1403_v63, %v1842_v47  ;;  %v250_v2 = vpop.f32.mrb[5].mxu0  ;;  %v330_v5 = vpop.f32.mrb[5].mxu1  ;;  %v408_v60 = vmax.f32 %v326_v57, 0.0  ;;  %v336_v61 = vadd.f32 %v1859_v3, %v1842_v47 }
  0xe5   :  { %v251_v4 = vadd.f32 %v1842_v47, %v250_v2  ;;  %1454 = vmatprep.mubr.msk.f32.mxu1 %vm432_vm1, %v391_v62  ;;  %v331_v55 = vadd.f32 %v1842_v47, %v330_v5 }
  0xe6   :  { %1455 = vmatmul.mubr.msk.f32.gmra.mrb[18].mxu1 %vm432_vm1, %v392_v0  ;;  %v394_v8 = vmax.f32 %v256_v1, 0.0  ;;  %v410_v0 = vmax.f32 %v336_v61, 0.0 }
  0xe7   :  { %v393_v6 = vmax.f32 %v251_v4, 0.0  ;;  %v1406_v7 = vpop.f32.mrb[6].mxu0  ;;  %v1865_v11 = vpop.f32.mrb[6].mxu1  ;;  %v409_v58 = vmax.f32 %v331_v55, 0.0 }
  0xe8   :  { %v266_v9 = vadd.f32 %v1406_v7, %v1842_v47  ;;  %v260_v10 = vpop.f32.mrb[7].mxu0  ;;  %v340_v13 = vpop.f32.mrb[7].mxu1  ;;  %v346_v59 = vadd.f32 %v1865_v11, %v1842_v47 }
  0xe9   :  { %v261_v12 = vadd.f32 %v1842_v47, %v260_v10  ;;  %1457 = vmatprep.mubr.msk.f32.mxu1 %vm432_vm1, %v393_v6  ;;  %v341_v51 = vadd.f32 %v1842_v47, %v340_v13 }
  0xea   :  { %1458 = vmatmul.mubr.msk.f32.gmra.mrb[20].mxu1 %vm432_vm1, %v394_v8  ;;  %v396_v16 = vmax.f32 %v266_v9, 0.0  ;;  %v412_v4 = vmax.f32 %v346_v59, 0.0 }
  0xeb   :  { %v395_v14 = vmax.f32 %v261_v12, 0.0  ;;  %v1409_v15 = vpop.f32.mrb[8].mxu0  ;;  %v1871_v19 = vpop.f32.mrb[8].mxu1  ;;  %v411_v62 = vmax.f32 %v341_v51, 0.0 }
  0xec   :  { %v276_v17 = vadd.f32 %v1409_v15, %v1842_v47  ;;  %v270_v18 = vpop.f32.mrb[9].mxu0  ;;  %v350_v21 = vpop.f32.mrb[9].mxu1  ;;  %v356_v3 = vadd.f32 %v1871_v19, %v1842_v47 }
  0xed   :  { %v271_v20 = vadd.f32 %v1842_v47, %v270_v18  ;;  %1460 = vmatprep.mubr.msk.f32.mxu1 %vm432_vm1, %v395_v14  ;;  %v351_v63 = vadd.f32 %v1842_v47, %v350_v21 }
  0xee   :  { %1461 = vmatmul.mubr.msk.f32.gmra.mrb[22].mxu1 %vm432_vm1, %v396_v16  ;;  %v398_v24 = vmax.f32 %v276_v17, 0.0  ;;  %v414_v7 = vmax.f32 %v356_v3, 0.0  ;;  %v1932_v17 = vld [vmem:[%s2168_s4] ss:$0 sm:$0xff] }
  0xef   :  { %v397_v22 = vmax.f32 %v271_v20, 0.0  ;;  %v1412_v23 = vpop.f32.mrb[10].mxu0  ;;  %v1436_v27 = vpop.f32.mrb[10].mxu1  ;;  %v413_v1 = vmax.f32 %v351_v63, 0.0 }
  0xf0   :  { %v286_v25 = vadd.f32 %v1412_v23, %v1842_v47  ;;  %v280_v26 = vpop.f32.mrb[11].mxu0  ;;  %v360_v29 = vpop.f32.mrb[11].mxu1  ;;  %v366_v8 = vadd.f32 %v1436_v27, %v1842_v47 }
  0xf1   :  { %v281_v28 = vadd.f32 %v1842_v47, %v280_v26  ;;  %1463 = vmatprep.mubr.msk.f32.mxu1 %vm432_vm1, %v397_v22  ;;  %v361_v2 = vadd.f32 %v1842_v47, %v360_v29 }
  0xf2   :  { %1464 = vmatmul.mubr.msk.f32.gmra.mrb[24].mxu1 %vm432_vm1, %v398_v24  ;;  %v400_v32 = vmax.f32 %v286_v25, 0.0  ;;  %v416_v11 = vmax.f32 %v366_v8, 0.0 }
  0xf3   :  { %v399_v30 = vmax.f32 %v281_v28, 0.0  ;;  %v1415_v31 = vpop.f32.mrb[12].mxu0  ;;  %v1439_v35 = vpop.f32.mrb[12].mxu1  ;;  %v415_v5 = vmax.f32 %v361_v2, 0.0 }
  0xf4   :  { %v296_v33 = vadd.f32 %v1415_v31, %v1842_v47  ;;  %v290_v34 = vpop.f32.mrb[13].mxu0  ;;  %v370_v37 = vpop.f32.mrb[13].mxu1  ;;  %v376_v12 = vadd.f32 %v1439_v35, %v1842_v47 }
  0xf5   :  { %v291_v36 = vadd.f32 %v1842_v47, %v290_v34  ;;  %1466 = vmatprep.mubr.msk.f32.mxu1 %vm432_vm1, %v399_v30  ;;  %v371_v6 = vadd.f32 %v1842_v47, %v370_v37 }
  0xf6   :  { %1467 = vmatmul.mubr.msk.f32.gmra.mrb[26].mxu1 %vm432_vm1, %v400_v32  ;;  %v402_v41 = vmax.f32 %v296_v33, 0.0  ;;  %v418_v14 = vmax.f32 %v376_v12, 0.0 }
  0xf7   :  { %v401_v38 = vmax.f32 %v291_v36, 0.0  ;;  %v1418_v39 = vpop.f32.mrb[14].mxu0  ;;  %v1442_v44 = vpop.f32.mrb[14].mxu1  ;;  %v417_v9 = vmax.f32 %v371_v6, 0.0 }
  0xf8   :  { %v306_v42 = vadd.f32 %v1418_v39, %v1842_v47  ;;  %v300_v43 = vpop.f32.mrb[15].mxu0  ;;  %v380_v46 = vpop.f32.mrb[15].mxu1  ;;  %v386_v15 = vadd.f32 %v1442_v44, %v1842_v47 }
  0xf9   :  { %v301_v45 = vadd.f32 %v1842_v47, %v300_v43  ;;  %1469 = vmatprep.mubr.msk.f32.mxu1 %vm432_vm1, %v401_v38  ;;  %v381_v10 = vadd.f32 %v1842_v47, %v380_v46 }
  0xfa   :  { %1470 = vmatmul.mubr.msk.f32.gmra.mrb[28].mxu1 %vm432_vm1, %v402_v41  ;;  %v404_v52 = vmax.f32 %v306_v42, 0.0  ;;  %v420_v16 = vmax.f32 %v386_v15, 0.0 }
  0xfb   :  { %v403_v48 = vmax.f32 %v301_v45, 0.0  ;;  %v419_v13 = vmax.f32 %v381_v10, 0.0 }
  0xfd   :  { %1472 = vmatprep.mubr.msk.f32.mxu1 %vm432_vm1, %v403_v48 }
  0xfe   :  { %1473 = vmatmul.mubr.msk.f32.gmra.mrb[30].mxu1 %vm432_vm1, %v404_v52 }
  0xff   :  { %1475 = vmatprep.mubr.msk.f32.mxu1 %vm432_vm1, %v405_v49 }
 0x102   :  { %1476 = vmatmul.mubr.msk.f32.gmra.mrb[32].mxu1 %vm432_vm1, %v406_v56 }
 0x103   :  { %1478 = vmatprep.mubr.msk.f32.mxu1 %vm432_vm1, %v407_v54 }
 0x106   :  { %1479 = vmatmul.mubr.msk.f32.gmra.mrb[34].mxu1 %vm432_vm1, %v408_v60 }
 0x107   :  { %1481 = vmatprep.mubr.msk.f32.mxu1 %vm432_vm1, %v409_v58 }
 0x10a   :  { %1482 = vmatmul.mubr.msk.f32.gmra.mrb[36].mxu1 %vm432_vm1, %v410_v0 }
 0x10b   :  { %1484 = vmatprep.mubr.msk.f32.mxu1 %vm432_vm1, %v411_v62 }
 0x10e   :  { %1485 = vmatmul.mubr.msk.f32.gmra.mrb[38].mxu1 %vm432_vm1, %v412_v4 }
 0x10f   :  { %1487 = vmatprep.mubr.msk.f32.mxu1 %vm432_vm1, %v413_v1 }
 0x112   :  { %1488 = vmatmul.mubr.msk.f32.gmra.mrb[40].mxu1 %vm432_vm1, %v414_v7 }
 0x113   :  { %1490 = vmatprep.mubr.msk.f32.mxu1 %vm432_vm1, %v415_v5 }
 0x116   :  { %1491 = vmatmul.mubr.msk.f32.gmra.mrb[42].mxu1 %vm432_vm1, %v416_v11 }
 0x117   :  { %1493 = vmatprep.mubr.msk.f32.mxu1 %vm432_vm1, %v417_v9 }
 0x11a   :  { %1494 = vmatmul.mubr.msk.f32.gmra.mrb[44].mxu1 %vm432_vm1, %v418_v14 }
 0x11b   :  { %1496 = vmatprep.mubr.msk.f32.mxu1 %vm432_vm1, %v419_v13 }
 0x11e   :  { %1497 = vmatmul.mubr.msk.f32.gmra.mrb[46].mxu1 %vm432_vm1, %v420_v16 }
 0x1b5   :  { %v1453_v18 = vpop.f32.mrb[16].mxu1 }
 0x1b6   :  { %v601_v19 = vadd.f32 %v1453_v18, %v1932_v17  ;;  %v595_v20 = vpop.f32.mrb[17].mxu1 }
 0x1b7   :  { %v596_v21 = vadd.f32 %v1932_v17, %v595_v20 }
 0x1b8   :  { %v755_v23 = vmax.f32 %v601_v19, 0.0 }
 0x1b9   :  { %v754_v22 = vmax.f32 %v596_v21, 0.0  ;;  %v1456_v47 = vpop.f32.mrb[18].mxu1 }
 0x1ba   :  { %v611_v24 = vadd.f32 %v1456_v47, %v1932_v17  ;;  %v605_v25 = vpop.f32.mrb[19].mxu1 }
 0x1bb   :  { %v606_v26 = vadd.f32 %v1932_v17, %v605_v25  ;;  %1507 = vmatprep.mubr.msk.f32.mxu0 %vm432_vm1, %v754_v22 }
 0x1bc   :  { %1508 = vmatmul.mubr.msk.f32.vlgmr.msra.gmra.mrb[16].mxu0 %vm432_vm1, %v755_v23  ;;  %v757_v29 = vmax.f32 %v611_v24, 0.0 }
 0x1bd   :  { %v756_v27 = vmax.f32 %v606_v26, 0.0  ;;  %v1459_v28 = vpop.f32.mrb[20].mxu1 }
 0x1be   :  { %v621_v30 = vadd.f32 %v1459_v28, %v1932_v17  ;;  %v615_v31 = vpop.f32.mrb[21].mxu1 }
 0x1bf   :  { %v616_v32 = vadd.f32 %v1932_v17, %v615_v31  ;;  %1510 = vmatprep.mubr.msk.f32.mxu0 %vm432_vm1, %v756_v27 }
 0x1c0   :  { %1511 = vmatmul.mubr.msk.f32.gmra.mrb[18].mxu0 %vm432_vm1, %v757_v29  ;;  %v759_v35 = vmax.f32 %v621_v30, 0.0 }
 0x1c1   :  { %v758_v33 = vmax.f32 %v616_v32, 0.0  ;;  %v1462_v34 = vpop.f32.mrb[22].mxu1 }
 0x1c2   :  { %v631_v36 = vadd.f32 %v1462_v34, %v1932_v17  ;;  %v625_v37 = vpop.f32.mrb[23].mxu1 }
 0x1c3   :  { %v626_v38 = vadd.f32 %v1932_v17, %v625_v37  ;;  %1513 = vmatprep.mubr.msk.f32.mxu0 %vm432_vm1, %v758_v33 }
 0x1c4   :  { %1514 = vmatmul.mubr.msk.f32.gmra.mrb[20].mxu0 %vm432_vm1, %v759_v35  ;;  %v761_v41 = vmax.f32 %v631_v36, 0.0 }
 0x1c5   :  { %v760_v39 = vmax.f32 %v626_v38, 0.0  ;;  %v1465_v40 = vpop.f32.mrb[24].mxu1 }
 0x1c6   :  { %v641_v42 = vadd.f32 %v1465_v40, %v1932_v17  ;;  %v635_v43 = vpop.f32.mrb[25].mxu1 }
 0x1c7   :  { %v636_v44 = vadd.f32 %v1932_v17, %v635_v43  ;;  %1516 = vmatprep.mubr.msk.f32.mxu0 %vm432_vm1, %v760_v39 }
 0x1c8   :  { %1517 = vmatmul.mubr.msk.f32.gmra.mrb[22].mxu0 %vm432_vm1, %v761_v41  ;;  %v763_v48 = vmax.f32 %v641_v42, 0.0 }
 0x1c9   :  { %v762_v45 = vmax.f32 %v636_v44, 0.0  ;;  %v1468_v46 = vpop.f32.mrb[26].mxu1 }
 0x1ca   :  { %v651_v49 = vadd.f32 %v1468_v46, %v1932_v17  ;;  %v645_v50 = vpop.f32.mrb[27].mxu1 }
 0x1cb   :  { %v646_v52 = vadd.f32 %v1932_v17, %v645_v50  ;;  %1519 = vmatprep.mubr.msk.f32.mxu0 %vm432_vm1, %v762_v45 }
 0x1cc   :  { %1520 = vmatmul.mubr.msk.f32.gmra.mrb[24].mxu0 %vm432_vm1, %v763_v48  ;;  %v765_v55 = vmax.f32 %v651_v49, 0.0 }
 0x1cd   :  { %v764_v53 = vmax.f32 %v646_v52, 0.0  ;;  %v1471_v54 = vpop.f32.mrb[28].mxu1  ;;  %v2001_v52 = vld [vmem:[%s2169_s6] ss:$0 sm:$0xff] }
 0x1ce   :  { %v661_v56 = vadd.f32 %v1471_v54, %v1932_v17  ;;  %v655_v57 = vpop.f32.mrb[29].mxu1 }
 0x1cf   :  { %v656_v58 = vadd.f32 %v1932_v17, %v655_v57  ;;  %1522 = vmatprep.mubr.msk.f32.mxu0 %vm432_vm1, %v764_v53 }
 0x1d0   :  { %1523 = vmatmul.mubr.msk.f32.gmra.mrb[26].mxu0 %vm432_vm1, %v765_v55  ;;  %v767_v61 = vmax.f32 %v661_v56, 0.0 }
 0x1d1   :  { %v766_v51 = vmax.f32 %v656_v58, 0.0  ;;  %v1474_v60 = vpop.f32.mrb[30].mxu1 }
 0x1d2   :  { %v671_v62 = vadd.f32 %v1474_v60, %v1932_v17  ;;  %v665_v63 = vpop.f32.mrb[31].mxu1 }
 0x1d3   :  { %v666_v0 = vadd.f32 %v1932_v17, %v665_v63  ;;  %1525 = vmatprep.mubr.msk.f32.mxu0 %vm432_vm1, %v766_v51 }
 0x1d4   :  { %1526 = vmatmul.mubr.msk.f32.gmra.mrb[28].mxu0 %vm432_vm1, %v767_v61  ;;  %v769_v2 = vmax.f32 %v671_v62, 0.0 }
 0x1d5   :  { %v768_v59 = vmax.f32 %v666_v0, 0.0  ;;  %v1477_v1 = vpop.f32.mrb[32].mxu1 }
 0x1d6   :  { %v681_v4 = vadd.f32 %v1477_v1, %v1932_v17  ;;  %v675_v3 = vpop.f32.mrb[33].mxu1 }
 0x1d7   :  { %v676_v5 = vadd.f32 %v1932_v17, %v675_v3  ;;  %1528 = vmatprep.mubr.msk.f32.mxu0 %vm432_vm1, %v768_v59 }
 0x1d8   :  { %1529 = vmatmul.mubr.msk.f32.gmra.mrb[30].mxu0 %vm432_vm1, %v769_v2  ;;  %v771_v8 = vmax.f32 %v681_v4, 0.0 }
 0x1d9   :  { %v770_v6 = vmax.f32 %v676_v5, 0.0  ;;  %v1480_v7 = vpop.f32.mrb[34].mxu1 }
 0x1da   :  { %v691_v9 = vadd.f32 %v1480_v7, %v1932_v17  ;;  %v685_v10 = vpop.f32.mrb[35].mxu1 }
 0x1db   :  { %v686_v11 = vadd.f32 %v1932_v17, %v685_v10  ;;  %1531 = vmatprep.mubr.msk.f32.mxu0 %vm432_vm1, %v770_v6 }
 0x1dc   :  { %1532 = vmatmul.mubr.msk.f32.gmra.mrb[32].mxu0 %vm432_vm1, %v771_v8  ;;  %v773_v14 = vmax.f32 %v691_v9, 0.0 }
 0x1dd   :  { %v772_v12 = vmax.f32 %v686_v11, 0.0  ;;  %v1483_v13 = vpop.f32.mrb[36].mxu1 }
 0x1de   :  { %v701_v15 = vadd.f32 %v1483_v13, %v1932_v17  ;;  %v695_v16 = vpop.f32.mrb[37].mxu1 }
 0x1df   :  { %v696_v18 = vadd.f32 %v1932_v17, %v695_v16  ;;  %1534 = vmatprep.mubr.msk.f32.mxu0 %vm432_vm1, %v772_v12 }
 0x1e0   :  { %1535 = vmatmul.mubr.msk.f32.gmra.mrb[34].mxu0 %vm432_vm1, %v773_v14  ;;  %v775_v21 = vmax.f32 %v701_v15, 0.0 }
 0x1e1   :  { %v774_v19 = vmax.f32 %v696_v18, 0.0  ;;  %v1486_v20 = vpop.f32.mrb[38].mxu1 }
 0x1e2   :  { %v711_v22 = vadd.f32 %v1486_v20, %v1932_v17  ;;  %v705_v47 = vpop.f32.mrb[39].mxu1 }
 0x1e3   :  { %v706_v23 = vadd.f32 %v1932_v17, %v705_v47  ;;  %1537 = vmatprep.mubr.msk.f32.mxu0 %vm432_vm1, %v774_v19 }
 0x1e4   :  { %1538 = vmatmul.mubr.msk.f32.gmra.mrb[36].mxu0 %vm432_vm1, %v775_v21  ;;  %v777_v26 = vmax.f32 %v711_v22, 0.0 }
 0x1e5   :  { %v776_v24 = vmax.f32 %v706_v23, 0.0  ;;  %v1489_v25 = vpop.f32.mrb[40].mxu1 }
 0x1e6   :  { %v721_v27 = vadd.f32 %v1489_v25, %v1932_v17  ;;  %v715_v28 = vpop.f32.mrb[41].mxu1 }
 0x1e7   :  { %v716_v29 = vadd.f32 %v1932_v17, %v715_v28  ;;  %1540 = vmatprep.mubr.msk.f32.mxu0 %vm432_vm1, %v776_v24 }
 0x1e8   :  { %1541 = vmatmul.mubr.msk.f32.gmra.mrb[38].mxu0 %vm432_vm1, %v777_v26  ;;  %v779_v32 = vmax.f32 %v721_v27, 0.0 }
 0x1e9   :  { %v778_v30 = vmax.f32 %v716_v29, 0.0  ;;  %v1492_v31 = vpop.f32.mrb[42].mxu1 }
 0x1ea   :  { %v731_v33 = vadd.f32 %v1492_v31, %v1932_v17  ;;  %v725_v34 = vpop.f32.mrb[43].mxu1 }
 0x1eb   :  { %v726_v35 = vadd.f32 %v1932_v17, %v725_v34  ;;  %1543 = vmatprep.mubr.msk.f32.mxu0 %vm432_vm1, %v778_v30 }
 0x1ec   :  { %1544 = vmatmul.mubr.msk.f32.gmra.mrb[40].mxu0 %vm432_vm1, %v779_v32  ;;  %v781_v38 = vmax.f32 %v731_v33, 0.0 }
 0x1ed   :  { %v780_v36 = vmax.f32 %v726_v35, 0.0  ;;  %v1495_v37 = vpop.f32.mrb[44].mxu1 }
 0x1ee   :  { %v741_v39 = vadd.f32 %v1495_v37, %v1932_v17  ;;  %v735_v40 = vpop.f32.mrb[45].mxu1 }
 0x1ef   :  { %v736_v41 = vadd.f32 %v1932_v17, %v735_v40  ;;  %1546 = vmatprep.mubr.msk.f32.mxu0 %vm432_vm1, %v780_v36 }
 0x1f0   :  { %1547 = vmatmul.mubr.msk.f32.gmra.mrb[42].mxu0 %vm432_vm1, %v781_v38  ;;  %v783_v44 = vmax.f32 %v741_v39, 0.0 }
 0x1f1   :  { %v782_v42 = vmax.f32 %v736_v41, 0.0  ;;  %v1498_v43 = vpop.f32.mrb[46].mxu1 }
 0x1f2   :  { %v751_v45 = vadd.f32 %v1498_v43, %v1932_v17  ;;  %v745_v46 = vpop.f32.mrb[47].mxu1 }
 0x1f3   :  { %v746_v48 = vadd.f32 %v1932_v17, %v745_v46  ;;  %1549 = vmatprep.mubr.msk.f32.mxu0 %vm432_vm1, %v782_v42 }
 0x1f4   :  { %1550 = vmatmul.mubr.msk.f32.gmra.mrb[44].mxu0 %vm432_vm1, %v783_v44  ;;  %v785_v50 = vmax.f32 %v751_v45, 0.0 }
 0x1f5   :  { %v784_v49 = vmax.f32 %v746_v48, 0.0 }
 0x1f7   :  { %1552 = vmatprep.mubr.msk.f32.mxu0 %vm432_vm1, %v784_v49 }
 0x1f8   :  { %1553 = vmatmul.mubr.msk.f32.gmra.mrb[46].mxu0 %vm432_vm1, %v785_v50 }
 0x28f   :  { %v1509_v53 = vpop.f32.mrb[16].mxu0 }
 0x290   :  { %v965_v54 = vadd.f32 %v1509_v53, %v2001_v52  ;;  %v959_v55 = vpop.f32.mrb[17].mxu0 }
 0x291   :  { %v960_v17 = vadd.f32 %v2001_v52, %v959_v55 }
 0x292   :  { %1577 = vtanh.f32 %v965_v54 }
 0x293   :  { %1579 = vtanh.f32 %v960_v17  ;;  %v1512_v56 = vpop.f32.mrb[18].mxu0 }
 0x294   :  { %v975_v57 = vadd.f32 %v1512_v56, %v2001_v52  ;;  %v969_v58 = vpop.f32.mrb[19].mxu0 }
 0x295   :  { %v970_v51 = vadd.f32 %v2001_v52, %v969_v58 }
 0x296   :  { %1581 = vtanh.f32 %v975_v57 }
 0x297   :  { %1583 = vtanh.f32 %v970_v51  ;;  %v1515_v60 = vpop.f32.mrb[20].mxu0 }
 0x298   :  { %v985_v61 = vadd.f32 %v1515_v60, %v2001_v52  ;;  %v979_v62 = vpop.f32.mrb[21].mxu0 }
 0x299   :  { %v980_v63 = vadd.f32 %v2001_v52, %v979_v62 }
 0x29a   :  { %1585 = vtanh.f32 %v985_v61 }
 0x29b   :  { %1587 = vtanh.f32 %v980_v63  ;;  %v1518_v0 = vpop.f32.mrb[22].mxu0 }
 0x29c   :  { %v1578_v59 = vpop.eup %1577  ;;  %v995_v1 = vadd.f32 %v1518_v0, %v2001_v52  ;;  %v989_v2 = vpop.f32.mrb[23].mxu0 }
 0x29d   :  { %v1580_v4 = vpop.eup %1579  ;;  %1151 = vst.msk [vmem:[%s2170_s7 + $0x8] sm:$0xff] %vm67_vm0, %v1578_v59  ;;  %v990_v3 = vadd.f32 %v2001_v52, %v989_v2 }
 0x29e   :  { %1150 = vst.msk [vmem:[%s2170_s7] sm:$0xff] %vm67_vm0, %v1580_v4  ;;  %1589 = vtanh.f32 %v995_v1 }
 0x29f   :  { %1591 = vtanh.f32 %v990_v3  ;;  %v1521_v5 = vpop.f32.mrb[24].mxu0 }
 0x2a0   :  { %v1582_v6 = vpop.eup %1581  ;;  %v1005_v7 = vadd.f32 %v1521_v5, %v2001_v52  ;;  %v999_v8 = vpop.f32.mrb[25].mxu0 }
 0x2a1   :  { %v1584_v9 = vpop.eup %1583  ;;  %1153 = vst.msk [vmem:[%s2170_s7 + $0x18] sm:$0xff] %vm67_vm0, %v1582_v6  ;;  %v1000_v10 = vadd.f32 %v2001_v52, %v999_v8 }
 0x2a2   :  { %1152 = vst.msk [vmem:[%s2170_s7 + $0x10] sm:$0xff] %vm67_vm0, %v1584_v9  ;;  %1593 = vtanh.f32 %v1005_v7 }
 0x2a3   :  { %1595 = vtanh.f32 %v1000_v10  ;;  %v1524_v11 = vpop.f32.mrb[26].mxu0 }
 0x2a4   :  { %v1586_v12 = vpop.eup %1585  ;;  %v1015_v13 = vadd.f32 %v1524_v11, %v2001_v52  ;;  %v1009_v14 = vpop.f32.mrb[27].mxu0 }
 0x2a5   :  { %v1588_v15 = vpop.eup %1587  ;;  %1155 = vst.msk [vmem:[%s2170_s7 + $0x28] sm:$0xff] %vm67_vm0, %v1586_v12  ;;  %v1010_v16 = vadd.f32 %v2001_v52, %v1009_v14 }
 0x2a6   :  { %1154 = vst.msk [vmem:[%s2170_s7 + $0x20] sm:$0xff] %vm67_vm0, %v1588_v15  ;;  %1597 = vtanh.f32 %v1015_v13 }
 0x2a7   :  { %1599 = vtanh.f32 %v1010_v16  ;;  %v1527_v18 = vpop.f32.mrb[28].mxu0 }
 0x2a8   :  { %v1590_v19 = vpop.eup %1589  ;;  %v1025_v20 = vadd.f32 %v1527_v18, %v2001_v52  ;;  %v1019_v21 = vpop.f32.mrb[29].mxu0 }
 0x2a9   :  { %v1592_v22 = vpop.eup %1591  ;;  %1157 = vst.msk [vmem:[%s2170_s7 + $0x38] sm:$0xff] %vm67_vm0, %v1590_v19  ;;  %v1020_v47 = vadd.f32 %v2001_v52, %v1019_v21 }
 0x2aa   :  { %1156 = vst.msk [vmem:[%s2170_s7 + $0x30] sm:$0xff] %vm67_vm0, %v1592_v22  ;;  %1601 = vtanh.f32 %v1025_v20 }
 0x2ab   :  { %1603 = vtanh.f32 %v1020_v47  ;;  %v1530_v23 = vpop.f32.mrb[30].mxu0 }
 0x2ac   :  { %v1594_v24 = vpop.eup %1593  ;;  %v1035_v25 = vadd.f32 %v1530_v23, %v2001_v52  ;;  %v1029_v26 = vpop.f32.mrb[31].mxu0 }
 0x2ad   :  { %v1596_v27 = vpop.eup %1595  ;;  %1159 = vst.msk [vmem:[%s2170_s7 + $0x48] sm:$0xff] %vm67_vm0, %v1594_v24  ;;  %v1030_v28 = vadd.f32 %v2001_v52, %v1029_v26 }
 0x2ae   :  { %1158 = vst.msk [vmem:[%s2170_s7 + $0x40] sm:$0xff] %vm67_vm0, %v1596_v27  ;;  %1605 = vtanh.f32 %v1035_v25 }
 0x2af   :  { %1607 = vtanh.f32 %v1030_v28  ;;  %v1533_v29 = vpop.f32.mrb[32].mxu0 }
 0x2b0   :  { %v1598_v30 = vpop.eup %1597  ;;  %v1045_v31 = vadd.f32 %v1533_v29, %v2001_v52  ;;  %v1039_v32 = vpop.f32.mrb[33].mxu0 }
 0x2b1   :  { %v1600_v33 = vpop.eup %1599  ;;  %1161 = vst.msk [vmem:[%s2170_s7 + $0x58] sm:$0xff] %vm67_vm0, %v1598_v30  ;;  %v1040_v34 = vadd.f32 %v2001_v52, %v1039_v32 }
 0x2b2   :  { %1160 = vst.msk [vmem:[%s2170_s7 + $0x50] sm:$0xff] %vm67_vm0, %v1600_v33  ;;  %1609 = vtanh.f32 %v1045_v31 }
 0x2b3   :  { %1611 = vtanh.f32 %v1040_v34  ;;  %v1536_v35 = vpop.f32.mrb[34].mxu0 }
 0x2b4   :  { %v1602_v36 = vpop.eup %1601  ;;  %v1055_v37 = vadd.f32 %v1536_v35, %v2001_v52  ;;  %v1049_v38 = vpop.f32.mrb[35].mxu0 }
 0x2b5   :  { %v1604_v39 = vpop.eup %1603  ;;  %1163 = vst.msk [vmem:[%s2170_s7 + $0x68] sm:$0xff] %vm67_vm0, %v1602_v36  ;;  %v1050_v40 = vadd.f32 %v2001_v52, %v1049_v38 }
 0x2b6   :  { %1162 = vst.msk [vmem:[%s2170_s7 + $0x60] sm:$0xff] %vm67_vm0, %v1604_v39  ;;  %1613 = vtanh.f32 %v1055_v37 }
 0x2b7   :  { %1615 = vtanh.f32 %v1050_v40  ;;  %v1539_v41 = vpop.f32.mrb[36].mxu0 }
 0x2b8   :  { %v1606_v42 = vpop.eup %1605  ;;  %v1065_v43 = vadd.f32 %v1539_v41, %v2001_v52  ;;  %v1059_v44 = vpop.f32.mrb[37].mxu0 }
 0x2b9   :  { %v1608_v45 = vpop.eup %1607  ;;  %1165 = vst.msk [vmem:[%s2170_s7 + $0x78] sm:$0xff] %vm67_vm0, %v1606_v42  ;;  %v1060_v46 = vadd.f32 %v2001_v52, %v1059_v44 }
 0x2ba   :  { %1164 = vst.msk [vmem:[%s2170_s7 + $0x70] sm:$0xff] %vm67_vm0, %v1608_v45  ;;  %1617 = vtanh.f32 %v1065_v43 }
 0x2bb   :  { %1619 = vtanh.f32 %v1060_v46  ;;  %v1542_v48 = vpop.f32.mrb[38].mxu0 }
 0x2bc   :  { %v1610_v49 = vpop.eup %1609  ;;  %v1075_v50 = vadd.f32 %v1542_v48, %v2001_v52  ;;  %v1069_v53 = vpop.f32.mrb[39].mxu0 }
 0x2bd   :  { %v1612_v54 = vpop.eup %1611  ;;  %1167 = vst.msk [vmem:[%s2170_s7 + $0x88] sm:$0xff] %vm67_vm0, %v1610_v49  ;;  %v1070_v55 = vadd.f32 %v2001_v52, %v1069_v53 }
 0x2be   :  { %1166 = vst.msk [vmem:[%s2170_s7 + $0x80] sm:$0xff] %vm67_vm0, %v1612_v54  ;;  %1621 = vtanh.f32 %v1075_v50 }
 0x2bf   :  { %1623 = vtanh.f32 %v1070_v55  ;;  %v1545_v17 = vpop.f32.mrb[40].mxu0 }
 0x2c0   :  { %v1614_v56 = vpop.eup %1613  ;;  %v1085_v57 = vadd.f32 %v1545_v17, %v2001_v52  ;;  %v1079_v58 = vpop.f32.mrb[41].mxu0 }
 0x2c1   :  { %v1616_v51 = vpop.eup %1615  ;;  %1169 = vst.msk [vmem:[%s2170_s7 + $0x98] sm:$0xff] %vm67_vm0, %v1614_v56  ;;  %v1080_v60 = vadd.f32 %v2001_v52, %v1079_v58 }
 0x2c2   :  { %1168 = vst.msk [vmem:[%s2170_s7 + $0x90] sm:$0xff] %vm67_vm0, %v1616_v51  ;;  %1625 = vtanh.f32 %v1085_v57 }
 0x2c3   :  { %1627 = vtanh.f32 %v1080_v60  ;;  %v1548_v61 = vpop.f32.mrb[42].mxu0 }
 0x2c4   :  { %v1618_v62 = vpop.eup %1617  ;;  %v1095_v63 = vadd.f32 %v1548_v61, %v2001_v52  ;;  %v1089_v0 = vpop.f32.mrb[43].mxu0 }
 0x2c5   :  { %v1620_v59 = vpop.eup %1619  ;;  %1171 = vst.msk [vmem:[%s2170_s7 + $0xa8] sm:$0xff] %vm67_vm0, %v1618_v62  ;;  %v1090_v1 = vadd.f32 %v2001_v52, %v1089_v0 }
 0x2c6   :  { %1170 = vst.msk [vmem:[%s2170_s7 + $0xa0] sm:$0xff] %vm67_vm0, %v1620_v59  ;;  %1629 = vtanh.f32 %v1095_v63 }
 0x2c7   :  { %1631 = vtanh.f32 %v1090_v1  ;;  %v1551_v2 = vpop.f32.mrb[44].mxu0 }
 0x2c8   :  { %v1622_v4 = vpop.eup %1621  ;;  %v1105_v3 = vadd.f32 %v1551_v2, %v2001_v52  ;;  %v1099_v5 = vpop.f32.mrb[45].mxu0 }
 0x2c9   :  { %v1624_v6 = vpop.eup %1623  ;;  %1173 = vst.msk [vmem:[%s2170_s7 + $0xb8] sm:$0xff] %vm67_vm0, %v1622_v4  ;;  %v1100_v7 = vadd.f32 %v2001_v52, %v1099_v5 }
 0x2ca   :  { %1172 = vst.msk [vmem:[%s2170_s7 + $0xb0] sm:$0xff] %vm67_vm0, %v1624_v6  ;;  %1633 = vtanh.f32 %v1105_v3 }
 0x2cb   :  { %1635 = vtanh.f32 %v1100_v7  ;;  %v1554_v8 = vpop.f32.mrb[46].mxu0 }
 0x2cc   :  { %v1626_v9 = vpop.eup %1625  ;;  %v1115_v10 = vadd.f32 %v1554_v8, %v2001_v52  ;;  %v1109_v11 = vpop.f32.mrb[47].mxu0 }
 0x2cd   :  { %v1628_v12 = vpop.eup %1627  ;;  %1175 = vst.msk [vmem:[%s2170_s7 + $0xc8] sm:$0xff] %vm67_vm0, %v1626_v9  ;;  %v1110_v13 = vadd.f32 %v2001_v52, %v1109_v11 }
 0x2ce   :  { %1174 = vst.msk [vmem:[%s2170_s7 + $0xc0] sm:$0xff] %vm67_vm0, %v1628_v12  ;;  %1637 = vtanh.f32 %v1115_v10 }
 0x2cf   :  { %1639 = vtanh.f32 %v1110_v13 }
 0x2d0   :  { %v1630_v14 = vpop.eup %1629 }
 0x2d1   :  { %v1632_v15 = vpop.eup %1631  ;;  %1177 = vst.msk [vmem:[%s2170_s7 + $0xd8] sm:$0xff] %vm67_vm0, %v1630_v14 }
 0x2d2   :  { %1176 = vst.msk [vmem:[%s2170_s7 + $0xd0] sm:$0xff] %vm67_vm0, %v1632_v15 }
 0x2d4   :  { %v1634_v52 = vpop.eup %1633 }
 0x2d5   :  { %v1636_v16 = vpop.eup %1635  ;;  %1179 = vst.msk [vmem:[%s2170_s7 + $0xe8] sm:$0xff] %vm67_vm0, %v1634_v52 }
 0x2d6   :  { %1178 = vst.msk [vmem:[%s2170_s7 + $0xe0] sm:$0xff] %vm67_vm0, %v1636_v16 }
 0x2d8   :  { %v1638_v18 = vpop.eup %1637 }
 0x2d9   :  { %v1640_v19 = vpop.eup %1639  ;;  %1181 = vst.msk [vmem:[%s2170_s7 + $0xf8] sm:$0xff] %vm67_vm0, %v1638_v18 }
 0x2da   :  { %1180 = vst.msk [vmem:[%s2170_s7 + $0xf0] sm:$0xff] %vm67_vm0, %v1640_v19 }

</bundles_post_ra>
